<compile_context>
chip_gen: v7x
topology: tpu7x:2x2x1
jax: 0.10.0
libtpu: 0.0.40
codegen_flags: <defaults>
</compile_context>

<pallas_src>
import jax
import jax.numpy as jnp
from jax import lax
from jax.experimental import pallas as pl
from jax.experimental.pallas import tpu as pltpu

_MIB = 1024 * 1024


def _tpu_vmem_capacity_bytes(default=64 * _MIB):
    """Best-effort physical VMEM query; conservative (v7x-sized) fallback."""
    try:
        info = pltpu.get_tpu_info()
    except Exception:
        return default
    for name in ("vmem_capacity_bytes", "vmem_bytes", "vmem_size_bytes"):
        v = getattr(info, name, None)
        if isinstance(v, int) and v > 0:
            return v
    return default


def _build_kernel(tr, ts, s_total, needs_col_mask, chunk):
    """clamp-to-1 + row-sum over a (tr, ts) tile of the (R, S) view."""
    n_full = ts // chunk
    rem = ts - n_full * chunk

    def kernel(x_ref, o_ref, acc_ref):
        # x_ref:   (tr, ts) input tile
        # o_ref:   (1, tr) lane-dense row sums (written on last spatial step)
        # acc_ref: (tr, 1) f32 accumulator, resident across the spatial grid axis
        k = pl.program_id(1)

        @pl.when(k == 0)
        def _init():
            acc_ref[...] = jnp.zeros_like(acc_ref)

        col0 = k * ts  # global column offset of this tile (scalar)

        def accumulate(start, width):
            xj = x_ref[:, start:start + width]          # static ref slice (free)
            # 1 - relu(1 - x) == min(x, 1); clamp in native dtype, accumulate f32.
            yj = jnp.minimum(xj, jnp.asarray(1.0, dtype=xj.dtype)).astype(jnp.float32)
            if needs_col_mask:
                col = col0 + start + lax.broadcasted_iota(jnp.int32, yj.shape, 1)
                yj = jnp.where(col < s_total, yj, 0.0)   # ragged last spatial tile
            acc_ref[...] += jnp.sum(yj, axis=-1, keepdims=True)

        for j in range(n_full):
            accumulate(j * chunk, chunk)
        if rem:
            accumulate(n_full * chunk, rem)

        @pl.when(k == pl.num_programs(1) - 1)
        def _finalize():
            # One small relayout per row tile -> lane-dense (1, tr) store.
            o_ref[...] = acc_ref[...].reshape(1, tr).astype(o_ref.dtype)

    return kernel


def basic_model_forward(x, *, row_tile_target=512, target_tile_bytes=8 * _MIB):
    """x: (B, C, H, W) float array -> (B, C, 1)."""
    B, C, H, W = x.shape
    R, S = B * C, H * W
    xf = x.reshape(R, S)  # free, contiguous reshape of the NCHW layout
    itemsize = jnp.dtype(x.dtype).itemsize

    vmem_cap = _tpu_vmem_capacity_bytes()
    small_vmem = vmem_cap <= 64 * _MIB            # v7x-like (64 MiB per TensorCore)
    vmem_limit = (48 if small_vmem else 64) * _MIB

    # ---- row tile (sublane axis of input, lane axis of output) ----
    if R <= row_tile_target:
        TR = R                                     # full dim is always a legal block
    else:
        TR = (row_tile_target // 128) * 128        # 512; cdiv grid handles remainder
    # Feed both TensorCores on 2-TC chips: ensure >=2 row-grid steps when possible.
    if small_vmem and TR == R and R >= 256:
        TR = max(128, ((-(-R // 2)) + 127) // 128 * 128)

    # ---- spatial tile (lane axis of input; reduction axis, last in grid) ----
    ts_budget = max(128, target_tile_bytes // max(1, TR * itemsize))
    ts_target = max(128, (ts_budget // 128) * 128)
    TS = S if S <= ts_target else ts_target
    needs_col_mask = (S % TS) != 0                 # ragged last spatial tile -> mask

    chunk = 1024 if (TS > 1024 and TS % 1024 == 0) else TS

    grid = (pl.cdiv(R, TR), pl.cdiv(S, TS))
    kernel = _build_kernel(TR, TS, S, needs_col_mask, chunk)

    out = pl.pallas_call(
        kernel,
        out_shape=jax.ShapeDtypeStruct((1, R), x.dtype),
        grid_spec=pltpu.PrefetchScalarGridSpec(
            num_scalar_prefetch=0,
            grid=grid,
            in_specs=[pl.BlockSpec((TR, TS), lambda i, k: (i, k))],
            out_specs=pl.BlockSpec((1, TR), lambda i, k: (0, i)),
            scratch_shapes=[pltpu.VMEM((TR, 1), jnp.float32)],
        ),
        compiler_params=pltpu.CompilerParams(
            dimension_semantics=("parallel", "arbitrary"),
            vmem_limit_bytes=vmem_limit,
        ),
        cost_estimate=pl.CostEstimate(
            flops=2 * R * S,
            transcendentals=0,
            bytes_accessed=R * S * itemsize + R * itemsize,
        ),
    )(xf)

    # Trailing unsqueeze / reshape (free in XLA) lives in the wrapper, not the kernel.
    return out.reshape(B, C, 1)


def _reference(x):
    y = 1.0 - jnp.maximum(1.0 - x, 0.0)
    return y.sum(-1).sum(-1)[..., None]


if __name__ == "__main__":
    key = jax.random.PRNGKey(0)
    B, C, H, W = 2, 4, 16, 16
    # Values spanning both sides of 1.0 so the clamp matters.
    x = jax.random.normal(key, (B, C, H, W), dtype=jnp.float32) * 2.0 + 0.5

    out = jax.block_until_ready(basic_model_forward(x))

    ref = _reference(x)
    assert out.shape == (B, C, 1), out.shape
    assert jnp.allclose(out, ref, atol=1e-4, rtol=1e-4), (
        f"max abs err {jnp.max(jnp.abs(out - ref))}"
    )
    print("KERNEL_OK")
</pallas_src>

<mosaic_0001>
module attributes {stable_mosaic.version = 11 : i64} {
  func.func @kernel(%arg0: i32, %arg1: i32, %arg2: memref<8x256xf32, #tpu.memory_space<vmem>>, %arg3: memref<1x8xf32, #tpu.memory_space<vmem>>, %arg4: memref<8x1xf32, #tpu.memory_space<vmem>>) attributes {dimension_semantics = [#tpu.dimension_semantics<parallel>, #tpu.dimension_semantics<arbitrary>], iteration_bounds = array<i64: 1, 1>, scalar_prefetch = 0 : i64, scratch_operands = 1 : i64, tpu.core_type = #tpu.core_type<tc>, window_params = [{transform_indices = @transform_0, window_bounds = array<i64: 8, 256>}, {transform_indices = @transform_1, window_bounds = array<i64: 1, 8>}]} {
    %c0_i32 = arith.constant 0 : i32
    %0 = arith.cmpi eq, %arg1, %c0_i32 : i32
    %1 = arith.extui %0 : i1 to i32
    %c0_i32_0 = arith.constant 0 : i32
    %2 = arith.cmpi ne, %1, %c0_i32_0 : i32
    scf.if %2 {
      %cst_9 = arith.constant 0.000000e+00 : f32
      %14 = vector.broadcast %cst_9 : f32 to vector<8x1xf32>
      %c0_10 = arith.constant 0 : index
      %c0_11 = arith.constant 0 : index
      %15 = vector.load %arg4[%c0_10, %c0_11] : memref<8x1xf32, #tpu.memory_space<vmem>>, vector<8x1xf32>
      tpu.vector_store %arg4[%c0_10, %c0_11], %14 {strides = array<i32>} : memref<8x1xf32, #tpu.memory_space<vmem>>, vector<8x1xf32>,
    } else {
    }
    %c0 = arith.constant 0 : index
    %c0_1 = arith.constant 0 : index
    %3 = vector.load %arg2[%c0, %c0_1] : memref<8x256xf32, #tpu.memory_space<vmem>>, vector<8x256xf32>
    %cst = arith.constant 1.000000e+00 : f32
    %4 = vector.broadcast %cst : f32 to vector<8x256xf32>
    %5 = arith.minimumf %3, %4 : vector<8x256xf32>
    %c0_2 = arith.constant 0 : index
    %c0_3 = arith.constant 0 : index
    %6 = vector.load %arg4[%c0_2, %c0_3] : memref<8x1xf32, #tpu.memory_space<vmem>>, vector<8x1xf32>
    %cst_4 = arith.constant dense<0.000000e+00> : vector<8xf32>
    %7 = vector.multi_reduction <add>, %5, %cst_4 [1] : vector<8x256xf32> to vector<8xf32>
    %8 = vector.shape_cast %7 : vector<8xf32> to vector<8x1xf32>
    %9 = arith.addf %6, %8 : vector<8x1xf32>
    %c0_5 = arith.constant 0 : index
    %c0_6 = arith.constant 0 : index
    %10 = vector.load %arg4[%c0_5, %c0_6] : memref<8x1xf32, #tpu.memory_space<vmem>>, vector<8x1xf32>
    tpu.vector_store %arg4[%c0_5, %c0_6], %9 {strides = array<i32>} : memref<8x1xf32, #tpu.memory_space<vmem>>, vector<8x1xf32>,
    %c0_i32_7 = arith.constant 0 : i32
    %11 = arith.cmpi eq, %arg1, %c0_i32_7 : i32
    %12 = arith.extui %11 : i1 to i32
    %c0_i32_8 = arith.constant 0 : i32
    %13 = arith.cmpi ne, %12, %c0_i32_8 : i32
    scf.if %13 {
      %c0_9 = arith.constant 0 : index
      %c0_10 = arith.constant 0 : index
      %14 = vector.load %arg4[%c0_9, %c0_10] : memref<8x1xf32, #tpu.memory_space<vmem>>, vector<8x1xf32>
      %15 = vector.shape_cast %14 : vector<8x1xf32> to vector<1x8xf32>
      %c0_11 = arith.constant 0 : index
      %c0_12 = arith.constant 0 : index
      %16 = vector.load %arg3[%c0_11, %c0_12] : memref<1x8xf32, #tpu.memory_space<vmem>>, vector<1x8xf32>
      tpu.vector_store %arg3[%c0_11, %c0_12], %15 {strides = array<i32>} : memref<1x8xf32, #tpu.memory_space<vmem>>, vector<1x8xf32>,
    } else {
    }
    return
  }
  func.func @transform_0(%arg0: i32, %arg1: i32) -> (i32, i32) {
    %c0_i32 = arith.constant 0 : i32
    return %arg0, %arg1 : i32, i32
  }
  func.func @transform_1(%arg0: i32, %arg1: i32) -> (i32, i32) {
    %c0_i32 = arith.constant 0 : i32
    %c0_i32_0 = arith.constant 0 : i32
    return %c0_i32, %arg0 : i32, i32
  }
}

</mosaic_0001>

<bundles_post_ra>
// kernel: tpu_custom_call.1
= control target key start
LH: loop header
LB: loop body
LE: loop exit
PB: predicated region body
PF: predicated region fallthrough
CT: control target
= control target key end

     0   :  { %6 = vsyncpa [#allocation4], 0  ;;  %s161_s0 = inlined_call_operand.hbm [shape: f32[8,256], index: 0, kind: input, shape index: {}]   ;;  %s162_s1 = inlined_call_operand.hbm [shape: f32[1,8], index: 1, kind: output, shape index: {}]  }
   0x1   :  { %7 = vsyncpa [#allocation5], 0  ;;  %s123_s6 = smov [#allocation3]   ;;  %s75_s10 = scalar_lea.hbm %s161_s0, 256 }
   0x2   :  { %s14_s7 = sshll.u32 %s123_s6, 4  ;;  %p76_p0 = scmp.ne.s32.totalorder %s161_s0, %s75_s10  ;;  %s15_s7 = int_to_ptr.vmem [resolvable:$true] %s14_s7 }
   0x3   :  { %p79_p1 = scmp.lt.u32.totalorder %s75_s10, %s161_s0 }
   0x5   :  { %p81_p2 = pnand %p79_p1, %p76_p0 }
   0x7   :  { %84 = shalt.err (!%p81_p2)
}
   0x8   :  { %s85_s15 = scalar_lea.vmem %s15_s7, 256  ;;  %p90_p4 = scmp.lt.s32.totalorder %s15_s7, %s15_s7 }
   0x9   :  { %p86_p3 = scmp.ne.s32.totalorder %s15_s7, %s85_s15  ;;  %p91_p5 = scmp.lt.s32.totalorder %s85_s15, %s85_s15 }
   0xb   :  { %p92_p6 = por %p91_p5, %p90_p4 }
   0xd   :  { %p93_p7 = pnand %p92_p6, %p86_p3 }
   0xf   :  { %96 = shalt.err (!%p93_p7)
}
  0x10   :  { %17 = dma.hbm_to_vmem [thread:$0]  %s161_s0, 256, %s15_s7, [#allocation4]  }
  0x11   :  { %119 = dma.done.wait [#allocation4], 256  }
  0x12   :  { %120 = vsyncadd [#allocation4], 4294967040  ;;  %vm25_vm0 = vcmask 7168   ;;  %v124_v0 = vmov 0.0   ;;  %v27_v1 = vld [vmem:[#allocation3] sm:$0xff]  ;;  %v28_v2 = vld [vmem:[#allocation3 + $0x8] sm:$0xff]  ;;  %v46_v11 = vlaneseq }
  0x13   :  { %26 = vst.msk [vmem:[#allocation2] sm:$0xff] %vm25_vm0, %v124_v0  ;;  %v29_v3 = vmin.f32 %v27_v1, 1.0  ;;  %v30_v4 = vmin.f32 %v28_v2, 1.0  ;;  %v125_v6 = vmov 0   ;;  %s126_s0 = smov [#allocation6]   ;;  %vm53_vm1 = vcmask 57344  }
  0x14   :  { %74 = vset.pattern.permute.xlu0 %v125_v6  ;;  %v47_v12 = vand.u32 127, %v46_v11  ;;  %v49_v13 = vshrl.u32 %v46_v11, 7  ;;  %s61_s18 = sshll.u32 %s126_s0, 4  ;;  %s62_s18 = int_to_ptr.vmem [resolvable:$true] %s61_s18 }
  0x15   :  { %v32_v5 = vadd.f32 %v30_v4, %v29_v3  ;;  %s97_s19 = scalar_lea.vmem %s62_s18, 16  ;;  %s101_s20 = scalar_lea.vmem %s62_s18, 32 }
  0x16   :  { %v50_v14 = vsub.s32 %v47_v12, %v49_v13  ;;  %p98_p8 = scmp.ne.s32.totalorder %s62_s18, %s97_s19  ;;  %p102_p9 = scmp.lt.s32.totalorder %s62_s18, %s62_s18 }
  0x17   :  { %33 = vadd.xlane.f32.xlu0 %v32_v5  ;;  %p103_p10 = scmp.lt.s32.totalorder %s101_s20, %s97_s19 }
  0x19   :  { %p104_p11 = por %p103_p10, %p102_p9 }
  0x1a   :  { %v31_v7 = vld [vmem:[#allocation2] sm:$0xff] }
  0x1b   :  { %p105_p12 = pnand %p104_p11, %p98_p8 }
  0xa4   :  { %v34_v8 = vpop.xlane.xlu0 %33 }
  0xa5   :  { %v35_v9 = vadd.f32 %v34_v8, %v31_v7 }
  0xa7   :  { %37 = vst.msk [vmem:[#allocation2] sm:$0xff] %vm25_vm0, %v35_v9 }
  0xae   :  { %v41_v10 = vld [vmem:[#allocation2] sm:$0xff] }
  0xaf   :  { %44 = vperm.xlu0 %74, %v41_v10  }
 0x12e   :  { %v45_v15 = vpop.permute.xlu0 %44 }
 0x12f   :  { %v51_v16 = vrot.slane %v45_v15, %v50_v14 }
 0x131   :  { %54 = vst.msk [vmem:[#allocation6] sm:$0x1] %vm53_vm1, %v51_v16 }
 0x132   :  { %108 = shalt.err (!%p105_p12)
}
 0x133   :  { %s109_s23 = scalar_lea.hbm %s162_s1, 16 }
 0x134   :  { %p110_p13 = scmp.ne.s32.totalorder %s162_s1, %s109_s23  ;;  %p113_p0 = scmp.lt.u32.totalorder %s109_s23, %s162_s1 }
 0x136   :  { %p115_p1 = pnand %p113_p0, %p110_p13 }
 0x138   :  { %118 = shalt.err (!%p115_p1)
}
 0x139   :  { %64 = dma.vmem_to_hbm [thread:$0]  %s62_s18, 16, %s162_s1, [#allocation5]  }
 0x13a   :  { %121 = dma.done.wait [#allocation5], 16  }
 0x13b   :  { %122 = vsyncadd [#allocation5], 4294967280 }
 0x13c   :  { %68 = vsyncpa [#allocation4], 1 }
 0x13d   :  { %69 = vsyncpa [#allocation5], 1 }

</bundles_post_ra>
